<compile_context>
chip_gen: v5e
topology: v5e:2x2
jax: 0.10.0
libtpu: 0.0.40
codegen_flags: <defaults>
</compile_context>

<pallas_src>
import jax
import jax.numpy as jnp
from jax import lax
from jax.experimental import pallas as pl
from jax.experimental.pallas import tpu as pltpu


def _embed_all_kernel(oidx_ref, tab_ref, out_ref):
    # oidx_ref : (B, F)        int32   indices already offset into the fused vocab
    # tab_ref  : (K_pad, F*D)  float32 block-diagonal fused embedding table
    # out_ref  : (B, F*D)      float32 final, lane-dense output slab
    B, F = oidx_ref.shape
    K = tab_ref.shape[0]

    oidx = oidx_ref[...]                                     # (B, F) int32
    # Fused-vocab axis K on lanes -> lane-dense compares.
    iota_k = lax.broadcasted_iota(jnp.int32, (B, K), 1)      # (B, K)

    # Combined one-hot: F hot positions per row (one per feature block).
    # F is tiny and static -> unrolled VPU compares OR-ed together.
    hot = iota_k == oidx[:, 0:1]
    for f in range(1, F):
        hot = hot | (iota_k == oidx[:, f:f + 1])
    onehot = hot.astype(tab_ref.dtype)                       # (B, K)

    # Single MXU matmul. The block-diagonal table guarantees out[b, f*D:(f+1)*D]
    # only picks up feature f's hot row; all other terms multiply exact zeros.
    # HIGHEST precision => the f32 embedding values are gathered bit-exactly.
    out_ref[...] = jnp.dot(
        onehot, tab_ref[...],
        preferred_element_type=jnp.float32,
        precision=lax.Precision.HIGHEST,
    ).astype(out_ref.dtype)


@jax.jit
def embedding_with_field(x_idx, fused_table, offsets):
    """x_idx: [B, F] integer indices; fused_table: [K_pad, F*D] block-diagonal
    table; offsets: [F] int32 cumulative vocab offsets.

    Returns [B, F, D] float32, matching torch.cat of per-feature embedding
    lookups along dim=1.
    """
    B, F = x_idx.shape
    K, FD = fused_table.shape
    D = FD // F

    # Per-feature offset add done once in the wrapper (not per-lane in-kernel).
    oidx = jnp.asarray(x_idx, jnp.int32) + offsets[None, :].astype(jnp.int32)

    out_flat = pl.pallas_call(
        _embed_all_kernel,
        out_shape=jax.ShapeDtypeStruct((B, FD), fused_table.dtype),
        in_specs=[
            pl.BlockSpec(memory_space=pltpu.MemorySpace.VMEM),   # oidx (B, F)
            pl.BlockSpec(memory_space=pltpu.MemorySpace.VMEM),   # fused table
        ],
        out_specs=pl.BlockSpec(memory_space=pltpu.MemorySpace.VMEM),
    )(oidx, fused_table)

    # Trivial row-major reshape (metadata-level) to the PyTorch [B, F, D] layout.
    return out_flat.reshape(B, F, D)


def build_fused_table(per_feature_tables, emb_dim, k_pad_multiple=128):
    """Pack per-feature tables [(V_f, D), ...] into a block-diagonal
    (K_pad, F*D) table plus the per-feature row offsets.

    K_pad is rounded up to `k_pad_multiple` (128 keeps a single K pass even on
    v5e's 128-wide MXU for this spec's total vocab of 65).
    """
    F = len(per_feature_tables)
    vocab_sizes = [int(t.shape[0]) for t in per_feature_tables]
    offsets = [0]
    for v in vocab_sizes[:-1]:
        offsets.append(offsets[-1] + v)
    total_v = sum(vocab_sizes)
    k_pad = -(-total_v // k_pad_multiple) * k_pad_multiple

    fused = jnp.zeros((k_pad, F * emb_dim), dtype=jnp.float32)
    for f, t in enumerate(per_feature_tables):
        fused = fused.at[offsets[f]:offsets[f] + t.shape[0],
                         f * emb_dim:(f + 1) * emb_dim].set(t)
    return fused, jnp.asarray(offsets, jnp.int32)


if __name__ == "__main__":
    # Small shapes consistent with the module's forward:
    #   x: [batch, feature_num] integer feature ids, one vocab per column.
    batch = 8
    emb_dim = 32
    vocab_sizes = [7, 13, 5, 20, 9, 11]
    feature_num = len(vocab_sizes)

    key = jax.random.PRNGKey(0)
    k_tab, k_x = jax.random.split(key)

    # Per-feature embedding tables (N(0,1) init, like nn.Embedding default).
    per_feature_tables = []
    for f, v in enumerate(vocab_sizes):
        kf = jax.random.fold_in(k_tab, f)
        per_feature_tables.append(
            jax.random.normal(kf, (v, emb_dim), dtype=jnp.float32))

    fused_table, offsets = build_fused_table(per_feature_tables, emb_dim)

    # Build indices column-by-column so each stays inside its own vocab.
    cols = []
    for f, v in enumerate(vocab_sizes):
        kf = jax.random.fold_in(k_x, f)
        cols.append(jax.random.randint(kf, (batch,), 0, v, dtype=jnp.int32))
    x = jnp.stack(cols, axis=1)                              # (B, F) int32

    out = embedding_with_field(x, fused_table, offsets)
    out = jax.block_until_ready(out)

    # Pure-JAX reference: out[b, f, :] = table_f[x[b, f], :]
    ref = jnp.stack([per_feature_tables[f][x[:, f]] for f in range(feature_num)],
                    axis=1)                                  # (B, F, D)
    assert out.shape == (batch, feature_num, emb_dim)
    assert jnp.allclose(out, ref, atol=1e-6, rtol=0.0)

    print("KERNEL_OK")
</pallas_src>

<mosaic_0001>
module attributes {stable_mosaic.version = 11 : i64} {
  func.func @_embed_all_kernel(%arg0: memref<8x6xi32, #tpu.memory_space<vmem>>, %arg1: memref<128x192xf32, #tpu.memory_space<vmem>>, %arg2: memref<8x192xf32, #tpu.memory_space<vmem>>) attributes {dimension_semantics = [], scalar_prefetch = 0 : i64, scratch_operands = 0 : i64, tpu.core_type = #tpu.core_type<tc>} {
    %c0 = arith.constant 0 : index
    %c0_0 = arith.constant 0 : index
    %0 = vector.load %arg0[%c0, %c0_0] : memref<8x6xi32, #tpu.memory_space<vmem>>, vector<8x6xi32>
    %1 = tpu.iota {dimensions = array<i32: 1>} : vector<8x128xi32>
    %2 = vector.extract_strided_slice %0 {offsets = [0, 0], sizes = [8, 1], strides = [1, 1]} : vector<8x6xi32> to vector<8x1xi32>
    %3 = vector.broadcast %2 : vector<8x1xi32> to vector<8x128xi32>
    %4 = arith.cmpi eq, %1, %3 : vector<8x128xi32>
    %5 = vector.extract_strided_slice %0 {offsets = [0, 1], sizes = [8, 1], strides = [1, 1]} : vector<8x6xi32> to vector<8x1xi32>
    %6 = vector.broadcast %5 : vector<8x1xi32> to vector<8x128xi32>
    %7 = arith.cmpi eq, %1, %6 : vector<8x128xi32>
    %8 = arith.ori %4, %7 : vector<8x128xi1>
    %9 = vector.extract_strided_slice %0 {offsets = [0, 2], sizes = [8, 1], strides = [1, 1]} : vector<8x6xi32> to vector<8x1xi32>
    %10 = vector.broadcast %9 : vector<8x1xi32> to vector<8x128xi32>
    %11 = arith.cmpi eq, %1, %10 : vector<8x128xi32>
    %12 = arith.ori %8, %11 : vector<8x128xi1>
    %13 = vector.extract_strided_slice %0 {offsets = [0, 3], sizes = [8, 1], strides = [1, 1]} : vector<8x6xi32> to vector<8x1xi32>
    %14 = vector.broadcast %13 : vector<8x1xi32> to vector<8x128xi32>
    %15 = arith.cmpi eq, %1, %14 : vector<8x128xi32>
    %16 = arith.ori %12, %15 : vector<8x128xi1>
    %17 = vector.extract_strided_slice %0 {offsets = [0, 4], sizes = [8, 1], strides = [1, 1]} : vector<8x6xi32> to vector<8x1xi32>
    %18 = vector.broadcast %17 : vector<8x1xi32> to vector<8x128xi32>
    %19 = arith.cmpi eq, %1, %18 : vector<8x128xi32>
    %20 = arith.ori %16, %19 : vector<8x128xi1>
    %21 = vector.extract_strided_slice %0 {offsets = [0, 5], sizes = [8, 1], strides = [1, 1]} : vector<8x6xi32> to vector<8x1xi32>
    %22 = vector.broadcast %21 : vector<8x1xi32> to vector<8x128xi32>
    %23 = arith.cmpi eq, %1, %22 : vector<8x128xi32>
    %24 = arith.ori %20, %23 : vector<8x128xi1>
    %25 = arith.extui %24 : vector<8x128xi1> to vector<8x128xi32>
    %26 = arith.sitofp %25 : vector<8x128xi32> to vector<8x128xf32>
    %c0_1 = arith.constant 0 : index
    %c0_2 = arith.constant 0 : index
    %27 = vector.load %arg1[%c0_1, %c0_2] : memref<128x192xf32, #tpu.memory_space<vmem>>, vector<128x192xf32>
    %cst = arith.constant dense<0.000000e+00> : vector<8x192xf32>
    %28 = tpu.matmul %26, %27, %cst {dimension_numbers = #tpu.dot_dimension_numbers<[1], [0], [0], [1], [0, 0, 1, 1], [], []>, precision = #tpu.contract_precision<fp32>} : vector<8x128xf32>, vector<128x192xf32>, vector<8x192xf32> -> vector<8x192xf32>
    %c0_3 = arith.constant 0 : index
    %c0_4 = arith.constant 0 : index
    %29 = vector.load %arg2[%c0_3, %c0_4] : memref<8x192xf32, #tpu.memory_space<vmem>>, vector<8x192xf32>
    tpu.vector_store %arg2[%c0_3, %c0_4], %28 {strides = array<i32>} : memref<8x192xf32, #tpu.memory_space<vmem>>, vector<8x192xf32>,
    return
  }
}

</mosaic_0001>

<bundles_post_ra>
// kernel: embedding_with_field.1
= control target key start
LH: loop header
LB: loop body
LE: loop exit
PB: predicated region body
PF: predicated region fallthrough
CT: control target
= control target key end

     0   :  { %v781_v0 = vmov 0   ;;  %v782_v2 = vmov 2   ;;  %v783_v10 = vmov 4   ;;  %v784_v39 = vmov 1   ;;  %s1419_s0 = inlined_call_operand.vmem [shape: s32[8,6], index: 0, kind: input, shape index: {}]   ;;  %s1420_s1 = inlined_call_operand.vmem [shape: f32[128,192], index: 1, kind: input, shape index: {}]   ;;  %s1421_s2 = inlined_call_operand.vmem [shape: f32[8,192], index: 2, kind: output, shape index: {}]  }
   0x1   :  { %774 = vset.pattern.permute.xlu0 %v781_v0  ;;  %v806_v1 = vld [vmem:[%s1419_s0] sm:$0xff]  ;;  %776 = vset.pattern.permute.xlu1 %v782_v2  ;;  %v75_v3 = vld [vmem:[%s1420_s1 + $0xf0] sm:$0xff]  ;;  %v785_v40 = vmov 3   ;;  %v786_v47 = vmov 5   ;;  %vm760_vm11 = vcmask 523264  }
   0x2   :  { %v73_v4 = vld [vmem:[%s1420_s1 + $0xe0] sm:$0xff]  ;;  %15 = vperm.xlu0 %774, %v806_v1   ;;  %24 = vperm.xlu1 %776, %v806_v1   ;;  %v816_v5 = vand.u32 4294901760, %v75_v3  ;;  %v71_v7 = vld [vmem:[%s1420_s1 + $0xd0] sm:$0xff] }
   0x3   :  { %v818_v6 = vand.u32 4294901760, %v73_v4  ;;  %v69_v8 = vld [vmem:[%s1420_s1 + $0xc0] sm:$0xff]  ;;  %v67_v9 = vld [vmem:[%s1420_s1 + $0xb0] sm:$0xff]  ;;  %778 = vset.pattern.permute.xlu2 %v783_v10  ;;  %v829_v11 = vand.u32 4294901760, %v71_v7 }
   0x4   :  { %v831_v12 = vand.u32 4294901760, %v69_v8  ;;  %v833_v13 = vand.u32 4294901760, %v67_v9  ;;  %v65_v14 = vld [vmem:[%s1420_s1 + $0xa0] sm:$0xff]  ;;  %v63_v15 = vld [vmem:[%s1420_s1 + $0x90] sm:$0xff]  ;;  %34 = vperm.xlu2 %778, %v806_v1   ;;  %v846_v17 = vsub.f32 %v75_v3, %v816_v5  ;;  %274 = vmatpush.msra.mxu3 %v816_v5 }
   0x5   :  { %v61_v16 = vld [vmem:[%s1420_s1 + $0x80] sm:$0xff]  ;;  %v849_v18 = vsub.f32 %v73_v4, %v818_v6  ;;  %v852_v19 = vand.u32 4294901760, %v65_v14  ;;  %v854_v20 = vand.u32 4294901760, %v63_v15  ;;  %v857_v21 = vsub.f32 %v71_v7, %v829_v11  ;;  %78 = vmatpush.msra.mxu0 %v816_v5  ;;  %v59_v37 = vld [vmem:[%s1420_s1 + $0x70] sm:$0xff] }
   0x6   :  { %v860_v22 = vsub.f32 %v69_v8, %v831_v12  ;;  %v864_v23 = vsub.f32 %v67_v9, %v833_v13  ;;  %v866_v24 = vand.u32 4294901760, %v61_v16  ;;  %v120_v25 = vand.u32 4294901760, %v846_v17  ;;  %221 = vmatpush.msra.mxu2 %v846_v17  ;;  %276 = vmatpush.msra.mxu3 %v818_v6  ;;  %v57_v38 = vld [vmem:[%s1420_s1 + $0x60] sm:$0xff]  ;;  %v55_v44 = vld [vmem:[%s1420_s1 + $0x50] sm:$0xff] }
   0x7   :  { %v126_v26 = vand.u32 4294901760, %v849_v18  ;;  %v873_v27 = vsub.f32 %v65_v14, %v852_v19  ;;  %v132_v28 = vand.u32 4294901760, %v857_v21  ;;  %80 = vmatpush.msra.mxu0 %v818_v6  ;;  %v879_v30 = vsub.f32 %v63_v15, %v854_v20  ;;  %v53_v46 = vld [vmem:[%s1420_s1 + $0x40] sm:$0xff]  ;;  %v51_v52 = vld [vmem:[%s1420_s1 + $0x30] sm:$0xff] }
   0x8   :  { %v138_v29 = vand.u32 4294901760, %v860_v22  ;;  %v121_v31 = vsub.f32 %v846_v17, %v120_v25  ;;  %224 = vmatpush.msra.mxu2 %v849_v18  ;;  %v144_v33 = vand.u32 4294901760, %v864_v23  ;;  %278 = vmatpush.msra.mxu3 %v829_v11  ;;  %v896_v36 = vsub.f32 %v61_v16, %v866_v24  ;;  %v49_v60 = vld [vmem:[%s1420_s1 + $0x20] sm:$0xff]  ;;  %v47_v2 = vld [vmem:[%s1420_s1 + $0x10] sm:$0xff]  ;;  %v76_v16 = vld [vmem:[%s1420_s1 + $0xf8] sm:$0xff] }
   0x9   :  { %v127_v32 = vsub.f32 %v849_v18, %v126_v26  ;;  %v133_v34 = vsub.f32 %v857_v21, %v132_v28  ;;  %v1432_v35 = vand.u32 4294901760, %v873_v27  ;;  %82 = vmatpush.msra.mxu0 %v829_v11  ;;  %v1429_v45 = vand.u32 4294901760, %v879_v30  ;;  %v45_v10 = vld [vmem:[%s1420_s1] sm:$0xff] }
   0xa   :  { %775 = vset.pattern.permute.xlu0 %v784_v39  ;;  %777 = vset.pattern.permute.xlu1 %v785_v40  ;;  %v122_v41 = vand.u32 4294901760, %v121_v31  ;;  %v139_v43 = vsub.f32 %v860_v22, %v138_v29  ;;  %v145_v49 = vsub.f32 %v864_v23, %v144_v33  ;;  %v920_v50 = vand.u32 4294901760, %v59_v37  ;;  %v74_v31 = vld [vmem:[%s1420_s1 + $0xe8] sm:$0xff] }
   0xb   :  { %v128_v42 = vand.u32 4294901760, %v127_v32  ;;  %19 = vperm.xlu0 %775, %v806_v1   ;;  %29 = vperm.xlu1 %777, %v806_v1   ;;  %v134_v48 = vand.u32 4294901760, %v133_v34  ;;  %v922_v51 = vand.u32 4294901760, %v57_v38  ;;  %v151_v53 = vsub.f32 %v873_v27, %v1432_v35 }
   0xc   :  { %779 = vset.pattern.permute.xlu2 %v786_v47  ;;  %123 = vmatpush.msra.mxu1 %v122_v41  ;;  %v1427_v54 = vand.u32 4294901760, %v896_v36  ;;  %v933_v55 = vand.u32 4294901760, %v55_v44  ;;  %v140_v56 = vand.u32 4294901760, %v139_v43  ;;  %v937_v57 = vsub.f32 %v59_v37, %v920_v50  ;;  %v72_v41 = vld [vmem:[%s1420_s1 + $0xd8] sm:$0xff] }
   0xd   :  { %39 = vperm.xlu2 %779, %v806_v1   ;;  %227 = vmatpush.msra.mxu2 %v857_v21  ;;  %v940_v58 = vsub.f32 %v57_v38, %v922_v51  ;;  %v942_v59 = vand.u32 4294901760, %v53_v46  ;;  %v949_v61 = vand.u32 4294901760, %v51_v52  ;;  %v146_v62 = vand.u32 4294901760, %v145_v49 }
   0xe   :  { %129 = vmatpush.msra.mxu1 %v128_v42  ;;  %280 = vmatpush.msra.mxu3 %v831_v12  ;;  %v157_v63 = vsub.f32 %v879_v30, %v1429_v45  ;;  %v1425_v0 = vand.u32 4294901760, %v937_v57  ;;  %v957_v1 = vsub.f32 %v55_v44, %v933_v55  ;;  %v163_v3 = vsub.f32 %v896_v36, %v1427_v54 }
   0xf   :  { %230 = vmatpush.msra.mxu2 %v860_v22  ;;  %84 = vmatpush.msra.mxu0 %v831_v12  ;;  %v967_v4 = vand.u32 4294901760, %v49_v60  ;;  %v152_v7 = vand.u32 4294901760, %v151_v53  ;;  %v1424_v8 = vand.u32 4294901760, %v940_v58  ;;  %v972_v9 = vsub.f32 %v53_v46, %v942_v59 }
  0x10   :  { %135 = vmatpush.msra.mxu1 %v134_v48  ;;  %282 = vmatpush.msra.mxu3 %v833_v13  ;;  %v980_v14 = vsub.f32 %v51_v52, %v949_v61  ;;  %v982_v15 = vand.u32 4294901760, %v47_v2  ;;  %v158_v32 = vand.u32 4294901760, %v157_v63  ;;  %v169_v34 = vsub.f32 %v937_v57, %v1425_v0  ;;  %v70_v52 = vld [vmem:[%s1420_s1 + $0xc8] sm:$0xff] }
  0x11   :  { %233 = vmatpush.msra.mxu2 %v864_v23  ;;  %86 = vmatpush.msra.mxu0 %v833_v13  ;;  %v1423_v37 = vand.u32 4294901760, %v957_v1  ;;  %v164_v38 = vand.u32 4294901760, %v163_v3  ;;  %v998_v39 = vsub.f32 %v49_v60, %v967_v4  ;;  %v1000_v40 = vand.u32 4294901760, %v45_v10  ;;  %v68_v3 = vld [vmem:[%s1420_s1 + $0xb8] sm:$0xff] }
  0x12   :  { %141 = vmatpush.msra.mxu1 %v140_v56  ;;  %284 = vmatpush.msra.mxu3 %v852_v19  ;;  %v175_v42 = vsub.f32 %v940_v58, %v1424_v8  ;;  %v1422_v43 = vand.u32 4294901760, %v972_v9  ;;  %v1010_v44 = vand.u32 4294901760, %v76_v16  ;;  %v1012_v46 = vand.u32 4294901760, %v74_v31 }
  0x13   :  { %236 = vmatpush.msra.mxu2 %v873_v27  ;;  %88 = vmatpush.msra.mxu0 %v852_v19  ;;  %v1426_v48 = vand.u32 4294901760, %v980_v14  ;;  %v1018_v49 = vsub.f32 %v47_v2, %v982_v15  ;;  %v170_v53 = vand.u32 4294901760, %v169_v34  ;;  %v181_v56 = vsub.f32 %v957_v1, %v1423_v37 }
  0x14   :  { %147 = vmatpush.msra.mxu1 %v146_v62  ;;  %286 = vmatpush.msra.mxu3 %v854_v20  ;;  %v1028_v60 = vsub.f32 %v76_v16, %v1010_v44  ;;  %v1030_v62 = vand.u32 4294901760, %v72_v41  ;;  %v1035_v63 = vsub.f32 %v45_v10, %v1000_v40  ;;  %v1038_v2 = vsub.f32 %v74_v31, %v1012_v46 }
  0x15   :  { %239 = vmatpush.msra.mxu2 %v879_v30  ;;  %90 = vmatpush.msra.mxu0 %v854_v20  ;;  %v187_v16 = vsub.f32 %v972_v9, %v1422_v43  ;;  %v1048_v34 = vand.u32 4294901760, %v70_v52  ;;  %v1431_v10 = vand.u32 4294901760, %v1018_v49  ;;  %v193_v43 = vsub.f32 %v980_v14, %v1426_v48 }
  0x16   :  { %153 = vmatpush.msra.mxu1 %v152_v7  ;;  %288 = vmatpush.msra.mxu3 %v866_v24  ;;  %v176_v7 = vand.u32 4294901760, %v175_v42  ;;  %v1430_v31 = vand.u32 4294901760, %v1028_v60  ;;  %v182_v42 = vand.u32 4294901760, %v181_v56  ;;  %v1062_v37 = vsub.f32 %v72_v41, %v1030_v62 }
  0x17   :  { %242 = vmatpush.msra.mxu2 %v896_v36  ;;  %92 = vmatpush.msra.mxu0 %v866_v24  ;;  %v1064_v8 = vand.u32 4294901760, %v68_v3  ;;  %v1434_v0 = vand.u32 4294901760, %v1035_v63  ;;  %v188_v56 = vand.u32 4294901760, %v187_v16  ;;  %v1075_v41 = vsub.f32 %v70_v52, %v1048_v34 }
  0x18   :  { %159 = vmatpush.msra.mxu1 %v158_v32  ;;  %290 = vmatpush.msra.mxu3 %v920_v50  ;;  %v1428_v32 = vand.u32 4294901760, %v998_v39  ;;  %v194_v16 = vand.u32 4294901760, %v193_v43  ;;  %v473_v52 = vand.u32 4294901760, %v1062_v37  ;;  %v1438_v17 = vand.u32 4294901760, %v937_v57 }
  0x19   :  { %245 = vmatpush.msra.mxu2 %v937_v57  ;;  %94 = vmatpush.msra.mxu0 %v920_v50  ;;  %v1090_v45 = vsub.f32 %v68_v3, %v1064_v8  ;;  %v1439_v18 = vand.u32 4294901760, %v940_v58  ;;  %v1442_v21 = vand.u32 4294901760, %v980_v14  ;;  %v1443_v22 = vand.u32 4294901760, %v998_v39  ;;  %v56_v57 = vld [vmem:[%s1420_s1 + $0x58] sm:$0xff] }
  0x1a   :  { %165 = vmatpush.msra.mxu1 %v164_v38  ;;  %292 = vmatpush.msra.mxu3 %v922_v51  ;;  %v66_v38 = vld [vmem:[%s1420_s1 + $0xa8] sm:$0xff]  ;;  %v199_v48 = vsub.f32 %v998_v39, %v1428_v32  ;;  %v205_v32 = vsub.f32 %v1018_v49, %v1431_v10  ;;  %v479_v10 = vand.u32 4294901760, %v1075_v41  ;;  %v1444_v23 = vand.u32 4294901760, %v1018_v49 }
  0x1b   :  { %248 = vmatpush.msra.mxu2 %v940_v58  ;;  %96 = vmatpush.msra.mxu0 %v922_v51  ;;  %v1077_v54 = vand.u32 4294901760, %v66_v38 }
  0x1c   :  { %171 = vmatpush.msra.mxu1 %v170_v53  ;;  %294 = vmatpush.msra.mxu3 %v933_v55  ;;  %v1433_v53 = vand.u32 4294901760, %v1038_v2  ;;  %v200_v43 = vand.u32 4294901760, %v199_v48  ;;  %v474_v48 = vsub.f32 %v1062_v37, %v473_v52 }
  0x1d   :  { %251 = vmatpush.msra.mxu2 %v957_v1  ;;  %98 = vmatpush.msra.mxu0 %v933_v55  ;;  %v1103_v3 = vsub.f32 %v66_v38, %v1077_v54 }
  0x1e   :  { %177 = vmatpush.msra.mxu1 %v176_v7  ;;  %296 = vmatpush.msra.mxu3 %v942_v59  ;;  %v462_v7 = vsub.f32 %v1028_v60, %v1430_v31  ;;  %v211_v31 = vsub.f32 %v1035_v63, %v1434_v0 }
  0x1f   :  { %254 = vmatpush.msra.mxu2 %v972_v9  ;;  %100 = vmatpush.msra.mxu0 %v942_v59 }
  0x20   :  { %183 = vmatpush.msra.mxu1 %v182_v42  ;;  %298 = vmatpush.msra.mxu3 %v949_v61  ;;  %v468_v42 = vsub.f32 %v1038_v2, %v1433_v53  ;;  %v463_v35 = vand.u32 4294901760, %v462_v7  ;;  %v206_v53 = vand.u32 4294901760, %v205_v32  ;;  %v212_v0 = vand.u32 4294901760, %v211_v31 }
  0x21   :  { %257 = vmatpush.msra.mxu2 %v980_v14  ;;  %102 = vmatpush.msra.mxu0 %v949_v61  ;;  %v480_v32 = vsub.f32 %v1075_v41, %v479_v10  ;;  %v491_v7 = vand.u32 4294901760, %v1103_v3 }
  0x22   :  { %189 = vmatpush.msra.mxu1 %v188_v56  ;;  %300 = vmatpush.msra.mxu3 %v967_v4  ;;  %v485_v56 = vand.u32 4294901760, %v1090_v45  ;;  %v469_v38 = vand.u32 4294901760, %v468_v42 }
  0x23   :  { %260 = vmatpush.msra.mxu2 %v998_v39  ;;  %104 = vmatpush.msra.mxu0 %v967_v4  ;;  %v481_v31 = vand.u32 4294901760, %v480_v32 }
  0x24   :  { %195 = vmatpush.msra.mxu1 %v194_v16  ;;  %302 = vmatpush.msra.mxu3 %v982_v15  ;;  %v475_v16 = vand.u32 4294901760, %v474_v48  ;;  %v486_v42 = vsub.f32 %v1090_v45, %v485_v56 }
  0x25   :  { %263 = vmatpush.msra.mxu2 %v1018_v49  ;;  %106 = vmatpush.msra.mxu0 %v982_v15 }
  0x26   :  { %201 = vmatpush.msra.mxu1 %v200_v43  ;;  %304 = vmatpush.msra.mxu3 %v1000_v40  ;;  %v492_v43 = vsub.f32 %v1103_v3, %v491_v7 }
  0x27   :  { %266 = vmatpush.msra.mxu2 %v1035_v63  ;;  %108 = vmatpush.msra.mxu0 %v1000_v40 }
  0x28   :  { %464 = vmatpush.msrb.mxu3 %v463_v35  ;;  %207 = vmatpush.msra.mxu1 %v206_v53  ;;  %v487_v35 = vand.u32 4294901760, %v486_v42  ;;  %v50_v42 = vld [vmem:[%s1420_s1 + $0x28] sm:$0xff] }
  0x29   :  { %419 = vmatpush.msrb.mxu2 %v1010_v44  ;;  %315 = vmatpush.msrb.mxu0 %v120_v25  ;;  %v62_v25 = vld [vmem:[%s1420_s1 + $0x88] sm:$0xff] }
  0x2a   :  { %470 = vmatpush.msrb.mxu3 %v469_v38  ;;  %213 = vmatpush.msra.mxu1 %v212_v0  ;;  %v493_v0 = vand.u32 4294901760, %v492_v43 }
  0x2b   :  { %421 = vmatpush.msrb.mxu2 %v1012_v46  ;;  %319 = vmatpush.msrb.mxu0 %v126_v26  ;;  %v1191_v26 = vand.u32 4294901760, %v62_v25 }
  0x2c   :  { %382 = vmatpush.msrb.mxu1 %v816_v5  ;;  %476 = vmatpush.msrb.mxu3 %v475_v16  ;;  %v64_v5 = vld [vmem:[%s1420_s1 + $0x98] sm:$0xff] }
  0x2d   :  { %423 = vmatpush.msrb.mxu2 %v1030_v62  ;;  %323 = vmatpush.msrb.mxu0 %v132_v28  ;;  %v60_v28 = vld [vmem:[%s1420_s1 + $0x78] sm:$0xff] }
  0x2e   :  { %384 = vmatpush.msrb.mxu1 %v818_v6  ;;  %482 = vmatpush.msrb.mxu3 %v481_v31  ;;  %v1148_v6 = vand.u32 4294901760, %v64_v5 }
  0x2f   :  { %425 = vmatpush.msrb.mxu2 %v1048_v34  ;;  %327 = vmatpush.msrb.mxu0 %v138_v29 }
  0x30   :  { %386 = vmatpush.msrb.mxu1 %v829_v11  ;;  %488 = vmatpush.msrb.mxu3 %v487_v35  ;;  %v1435_v11 = vand.u32 4294901760, %v873_v27  ;;  %v1194_v27 = vsub.f32 %v64_v5, %v1148_v6  ;;  %v1266_v35 = vand.u32 4294901760, %v50_v42 }
  0x31   :  { %427 = vmatpush.msrb.mxu2 %v1064_v8  ;;  %331 = vmatpush.msrb.mxu0 %v144_v33  ;;  %v1204_v33 = vsub.f32 %v62_v25, %v1191_v26 }
  0x32   :  { %388 = vmatpush.msrb.mxu1 %v831_v12  ;;  %494 = vmatpush.msrb.mxu3 %v493_v0  ;;  %v1436_v12 = vand.u32 4294901760, %v879_v30  ;;  %v497_v29 = vand.u32 4294901760, %v1194_v27  ;;  %v1201_v30 = vand.u32 4294901760, %v60_v28 }
  0x33   :  { %429 = vmatpush.msrb.mxu2 %v1077_v54  ;;  %780 = vset.pattern.permute.xlu0 %v786_v47 }
  0x34   :  { %390 = vmatpush.msrb.mxu1 %v833_v13  ;;  %335 = vmatpush.msrb.mxu0 %v1435_v11  ;;  %v1437_v13 = vand.u32 4294901760, %v896_v36  ;;  %v58_v36 = vld [vmem:[%s1420_s1 + $0x68] sm:$0xff]  ;;  %v498_v47 = vsub.f32 %v1194_v27, %v497_v29  ;;  %v48_v11 = vld [vmem:[%s1420_s1 + $0x18] sm:$0xff] }
  0x35   :  { %431 = vmatpush.msrb.mxu2 %v1148_v6 }
  0x36   :  { %392 = vmatpush.msrb.mxu1 %v852_v19  ;;  %339 = vmatpush.msrb.mxu0 %v1436_v12  ;;  %v1440_v19 = vand.u32 4294901760, %v957_v1  ;;  %v499_v58 = vand.u32 4294901760, %v498_v47  ;;  %v1227_v1 = vand.u32 4294901760, %v56_v57 }
  0x37   :  { %433 = vmatpush.msrb.mxu2 %v1191_v26 }
  0x38   :  { %394 = vmatpush.msrb.mxu1 %v854_v20  ;;  %343 = vmatpush.msrb.mxu0 %v1437_v13  ;;  %v1441_v20 = vand.u32 4294901760, %v972_v9  ;;  %v54_v9 = vld [vmem:[%s1420_s1 + $0x48] sm:$0xff] }
  0x39   :  { %435 = vmatpush.msrb.mxu2 %v1201_v30  ;;  %500 = vmatpush.msrb.mxu3 %v499_v58  ;;  %v1239_v39 = vand.u32 4294901760, %v54_v9 }
  0x3a   :  { %396 = vmatpush.msrb.mxu1 %v866_v24  ;;  %347 = vmatpush.msrb.mxu0 %v1438_v17  ;;  %v1445_v24 = vand.u32 4294901760, %v1035_v63  ;;  %v52_v63 = vld [vmem:[%s1420_s1 + $0x38] sm:$0xff] }
  0x3b   :  { %v1250_v38 = vand.u32 4294901760, %v52_v63  ;;  %v1253_v32 = vsub.f32 %v54_v9, %v1239_v39 }
  0x3c   :  { %398 = vmatpush.msrb.mxu1 %v920_v50  ;;  %351 = vmatpush.msrb.mxu0 %v1439_v18  ;;  %v503_v50 = vand.u32 4294901760, %v1204_v33  ;;  %v1279_v18 = vand.u32 4294901760, %v48_v11 }
  0x3d   :  { %v527_v43 = vand.u32 4294901760, %v1253_v32  ;;  %v1269_v0 = vsub.f32 %v52_v63, %v1250_v38 }
  0x3e   :  { %400 = vmatpush.msrb.mxu1 %v922_v51  ;;  %355 = vmatpush.msrb.mxu0 %v1440_v19  ;;  %v1214_v51 = vand.u32 4294901760, %v58_v36  ;;  %v1282_v19 = vsub.f32 %v50_v42, %v1266_v35  ;;  %v1295_v25 = vsub.f32 %v48_v11, %v1279_v18 }
  0x3f   :  { %v528_v13 = vsub.f32 %v1253_v32, %v527_v43  ;;  %v533_v17 = vand.u32 4294901760, %v1269_v0 }
  0x40   :  { %402 = vmatpush.msrb.mxu1 %v933_v55  ;;  %359 = vmatpush.msrb.mxu0 %v1441_v20  ;;  %v1217_v55 = vsub.f32 %v60_v28, %v1201_v30  ;;  %v545_v47 = vand.u32 4294901760, %v1295_v25 }
  0x41   :  { %437 = vmatpush.msrb.mxu2 %v1214_v51  ;;  %v529_v20 = vand.u32 4294901760, %v528_v13 }
  0x42   :  { %404 = vmatpush.msrb.mxu1 %v942_v59  ;;  %363 = vmatpush.msrb.mxu0 %v1442_v21  ;;  %v504_v59 = vsub.f32 %v1204_v33, %v503_v50  ;;  %v534_v21 = vsub.f32 %v1269_v0, %v533_v17 }
  0x43   :  { %439 = vmatpush.msrb.mxu2 %v1227_v1 }
  0x44   :  { %406 = vmatpush.msrb.mxu1 %v949_v61  ;;  %367 = vmatpush.msrb.mxu0 %v1443_v22  ;;  %v509_v61 = vand.u32 4294901760, %v1217_v55  ;;  %v505_v14 = vand.u32 4294901760, %v504_v59  ;;  %v46_v22 = vld [vmem:[%s1420_s1 + $0x8] sm:$0xff]  ;;  %v535_v28 = vand.u32 4294901760, %v534_v21  ;;  %v546_v59 = vsub.f32 %v1295_v25, %v545_v47 }
  0x45   :  { %441 = vmatpush.msrb.mxu2 %v1239_v39 }
  0x46   :  { %408 = vmatpush.msrb.mxu1 %v967_v4  ;;  %371 = vmatpush.msrb.mxu0 %v1444_v23  ;;  %v1230_v4 = vsub.f32 %v58_v36, %v1214_v51  ;;  %v539_v23 = vand.u32 4294901760, %v1282_v19 }
  0x47   :  { %506 = vmatpush.msrb.mxu3 %v505_v14  ;;  %443 = vmatpush.msrb.mxu2 %v1250_v38  ;;  %v547_v14 = vand.u32 4294901760, %v546_v59  ;;  %v1447_v59 = vand.u32 4294901760, %v1038_v2 }
  0x48   :  { %410 = vmatpush.msrb.mxu1 %v982_v15  ;;  %375 = vmatpush.msrb.mxu0 %v1445_v24  ;;  %v510_v15 = vsub.f32 %v1217_v55, %v509_v61  ;;  %v515_v49 = vand.u32 4294901760, %v1230_v4  ;;  %v1292_v24 = vand.u32 4294901760, %v46_v22  ;;  %v540_v36 = vsub.f32 %v1282_v19, %v539_v23 }
  0x49   :  { %445 = vmatpush.msrb.mxu2 %v1266_v35 }
  0x4a   :  { %412 = vmatpush.msrb.mxu1 %v1000_v40  ;;  %v1242_v40 = vsub.f32 %v56_v57, %v1227_v1  ;;  %v511_v53 = vand.u32 4294901760, %v510_v15  ;;  %v516_v16 = vsub.f32 %v1230_v4, %v515_v49  ;;  %v1303_v57 = vsub.f32 %v46_v22, %v1292_v24 }
  0x4b   :  { %447 = vmatpush.msrb.mxu2 %v1279_v18  ;;  %v541_v58 = vand.u32 4294901760, %v540_v36  ;;  %v1446_v36 = vand.u32 4294901760, %v1028_v60 }
  0x4c   :  { %v521_v48 = vand.u32 4294901760, %v1242_v40  ;;  %512 = vmatpush.msrb.mxu3 %v511_v53  ;;  %v517_v5 = vand.u32 4294901760, %v516_v16  ;;  %v551_v9 = vand.u32 4294901760, %v1303_v57 }
  0x4d   :  { %449 = vmatpush.msrb.mxu2 %v1292_v24 }
  0x4e   :  { %v522_v31 = vsub.f32 %v1242_v40, %v521_v48  ;;  %518 = vmatpush.msrb.mxu3 %v517_v5  ;;  %v552_v15 = vsub.f32 %v1303_v57, %v551_v9 }
  0x50   :  { %v523_v12 = vand.u32 4294901760, %v522_v31  ;;  %v553_v63 = vand.u32 4294901760, %v552_v15  ;;  %v12_v31 = vlaneseq }
  0x52   :  { %524 = vmatpush.msrb.mxu3 %v523_v12  ;;  %v13_v5 = vand.u32 127, %v12_v31 }
  0x54   :  { %530 = vmatpush.msrb.mxu3 %v529_v20  ;;  %v787_v20 = vmov 0.0  }
  0x56   :  { %536 = vmatpush.msrb.mxu3 %v535_v28 }
  0x58   :  { %542 = vmatpush.msrb.mxu3 %v541_v58 }
  0x5a   :  { %548 = vmatpush.msrb.mxu3 %v547_v14 }
  0x5c   :  { %554 = vmatpush.msrb.mxu3 %v553_v63 }
  0x5e   :  { %v35_v53 = vpop.permute.xlu2 %34 }
  0x5f   :  { %vm36_vm7 = vcmp.eq.s32.totalorder %v13_v5, %v35_v53 }
  0x67   :  { %v40_v11 = vpop.permute.xlu2 %39 }
  0x68   :  { %vm41_vm6 = vcmp.eq.s32.totalorder %v13_v5, %v40_v11 }
  0x74   :  { %v16_v16 = vpop.permute.xlu0 %15  ;;  %v25_v42 = vpop.permute.xlu1 %24 }
  0x75   :  { %vm17_vm0 = vcmp.eq.s32.totalorder %v13_v5, %v16_v16  ;;  %vm26_vm3 = vcmp.eq.s32.totalorder %v13_v5, %v25_v42 }
  0x7d   :  { %v20_v12 = vpop.permute.xlu0 %19  ;;  %v30_v13 = vpop.permute.xlu1 %29 }
  0x7e   :  { %vm21_vm1 = vcmp.eq.s32.totalorder %v13_v5, %v20_v12  ;;  %vm31_vm2 = vcmp.eq.s32.totalorder %v13_v5, %v30_v13 }
  0x7f   :  { %vm22_vm4 = vmor %vm17_vm0, %vm21_vm1 }
  0x80   :  { %vm27_vm5 = vmor %vm22_vm4, %vm26_vm3 }
  0x81   :  { %vm32_vm8 = vmor %vm27_vm5, %vm31_vm2 }
  0x82   :  { %vm37_vm9 = vmor %vm32_vm8, %vm36_vm7 }
  0x83   :  { %vm42_vm10 = vmor %vm37_vm9, %vm41_vm6 }
  0x84   :  { %v1312_v21 = vsel %vm42_vm10, 1.0, %v787_v20 }
  0x85   :  { %215 = vmatmul.f32.vlgmr.msra.gmra.mxu1 %v1312_v21  ;;  %v1317_v22 = vsub.f32 %v1312_v21, %v1312_v21 }
  0x86   :  { %615 = vmatpush.msra.mxu1 %v1010_v44 }
  0x87   :  { %269 = vmatmul.f32.vlgmr.msra.gmra.mxu2 %v1317_v22  ;;  %v1322_v28 = vand.u32 4294901760, %v1317_v22 }
  0x88   :  { %617 = vmatpush.msra.mxu1 %v1012_v46  ;;  %656 = vmatpush.msra.mxu2 %v1446_v36 }
  0x89   :  { %308 = vmatmul.f32.vlgmr.msra.gmra.mxu3 %v1322_v28  ;;  %v112_v58 = vsub.f32 %v1317_v22, %v1322_v28 }
  0x8a   :  { %619 = vmatpush.msra.mxu1 %v1030_v62  ;;  %660 = vmatpush.msra.mxu2 %v1447_v59 }
  0x8b   :  { %723 = vmatpush.msra.mxu3 %v1010_v44  ;;  %v113_v14 = vand.u32 4294901760, %v112_v58 }
  0x8c   :  { %621 = vmatpush.msra.mxu1 %v1048_v34  ;;  %664 = vmatpush.msra.mxu2 %v473_v52 }
  0x8d   :  { %725 = vmatpush.msra.mxu3 %v1012_v46  ;;  %114 = vmatmul.f32.vlgmr.msra.gmra.mxu0 %v113_v14 }
  0x8e   :  { %414 = vmatmul.f32.vlgmr.msrb.gmra.mxu1 %v1312_v21  ;;  %562 = vmatpush.msra.mxu0 %v1028_v60 }
  0x8f   :  { %623 = vmatpush.msra.mxu1 %v1064_v8  ;;  %668 = vmatpush.msra.mxu2 %v479_v10 }
  0x90   :  { %727 = vmatpush.msra.mxu3 %v1030_v62  ;;  %455 = vmatmul.f32.vlgmr.msrb.gmra.mxu2 %v113_v14 }
  0x91   :  { %565 = vmatpush.msra.mxu0 %v1038_v2  ;;  %625 = vmatpush.msra.mxu1 %v1077_v54 }
  0x92   :  { %672 = vmatpush.msra.mxu2 %v485_v56  ;;  %729 = vmatpush.msra.mxu3 %v1048_v34 }
  0x93   :  { %556 = vmatmul.f32.vlgmr.msrb.gmra.mxu3 %v1312_v21  ;;  %568 = vmatpush.msra.mxu0 %v1062_v37 }
  0x94   :  { %627 = vmatpush.msra.mxu1 %v1148_v6  ;;  %676 = vmatpush.msra.mxu2 %v491_v7 }
  0x95   :  { %731 = vmatpush.msra.mxu3 %v1064_v8  ;;  %571 = vmatpush.msra.mxu0 %v1075_v41 }
  0x96   :  { %629 = vmatpush.msra.mxu1 %v1191_v26  ;;  %680 = vmatpush.msra.mxu2 %v497_v29 }
  0x97   :  { %733 = vmatpush.msra.mxu3 %v1077_v54  ;;  %377 = vmatmul.f32.vlgmr.msrb.gmra.mxu0 %v1312_v21 }
  0x98   :  { %574 = vmatpush.msra.mxu0 %v1090_v45  ;;  %631 = vmatpush.msra.mxu1 %v1201_v30 }
  0x99   :  { %684 = vmatpush.msra.mxu2 %v503_v50  ;;  %735 = vmatpush.msra.mxu3 %v1148_v6 }
  0x9a   :  { %577 = vmatpush.msra.mxu0 %v1103_v3  ;;  %633 = vmatpush.msra.mxu1 %v1214_v51 }
  0x9b   :  { %688 = vmatpush.msra.mxu2 %v509_v61  ;;  %737 = vmatpush.msra.mxu3 %v1191_v26 }
  0x9c   :  { %580 = vmatpush.msra.mxu0 %v1194_v27  ;;  %635 = vmatpush.msra.mxu1 %v1227_v1 }
  0x9d   :  { %692 = vmatpush.msra.mxu2 %v515_v49  ;;  %739 = vmatpush.msra.mxu3 %v1201_v30 }
  0x9e   :  { %583 = vmatpush.msra.mxu0 %v1204_v33  ;;  %637 = vmatpush.msra.mxu1 %v1239_v39 }
  0x9f   :  { %696 = vmatpush.msra.mxu2 %v521_v48  ;;  %741 = vmatpush.msra.mxu3 %v1214_v51 }
  0xa0   :  { %586 = vmatpush.msra.mxu0 %v1217_v55  ;;  %639 = vmatpush.msra.mxu1 %v1250_v38 }
  0xa1   :  { %700 = vmatpush.msra.mxu2 %v527_v43  ;;  %743 = vmatpush.msra.mxu3 %v1227_v1 }
  0xa2   :  { %589 = vmatpush.msra.mxu0 %v1230_v4  ;;  %641 = vmatpush.msra.mxu1 %v1266_v35 }
  0xa3   :  { %704 = vmatpush.msra.mxu2 %v533_v17  ;;  %745 = vmatpush.msra.mxu3 %v1239_v39 }
  0xa4   :  { %592 = vmatpush.msra.mxu0 %v1242_v40  ;;  %643 = vmatpush.msra.mxu1 %v1279_v18 }
  0xa5   :  { %708 = vmatpush.msra.mxu2 %v539_v23  ;;  %747 = vmatpush.msra.mxu3 %v1250_v38 }
  0xa6   :  { %595 = vmatpush.msra.mxu0 %v1253_v32  ;;  %645 = vmatpush.msra.mxu1 %v1292_v24 }
  0xa7   :  { %712 = vmatpush.msra.mxu2 %v545_v47  ;;  %749 = vmatpush.msra.mxu3 %v1266_v35 }
  0xa8   :  { %649 = vmatmul.f32.vlgmr.msra.gmra.mxu1 %v1322_v28  ;;  %598 = vmatpush.msra.mxu0 %v1269_v0 }
  0xa9   :  { %716 = vmatpush.msra.mxu2 %v551_v9  ;;  %751 = vmatpush.msra.mxu3 %v1279_v18 }
  0xaa   :  { %718 = vmatmul.f32.vlgmr.msra.gmra.mxu2 %v1312_v21  ;;  %601 = vmatpush.msra.mxu0 %v1282_v19 }
  0xab   :  { %753 = vmatpush.msra.mxu3 %v1292_v24 }
  0xac   :  { %755 = vmatmul.f32.vlgmr.msra.gmra.mxu3 %v1312_v21  ;;  %604 = vmatpush.msra.mxu0 %v1295_v25 }
  0xae   :  { %607 = vmatpush.msra.mxu0 %v1303_v57 }
  0xaf   :  { %610 = vmatmul.f32.vlgmr.msra.gmra.mxu0 %v1317_v22 }
 0x102   :  { %v216_v45 = vpop.f32.mrf.mxu1 }
 0x10a   :  { %v115_v54 = vpop.f32.mrf.mxu0  ;;  %v270_v37 = vpop.f32.mrf.mxu2 }
 0x10b   :  { %v217_v8 = vadd.f32 %v216_v45, %v115_v54  ;;  %v415_v34 = vpop.f32.mrf.mxu1 }
 0x10c   :  { %v309_v46 = vpop.f32.mrf.mxu3 }
 0x10d   :  { %v271_v44 = vadd.f32 %v270_v37, %v217_v8 }
 0x10f   :  { %v310_v60 = vadd.f32 %v309_v46, %v271_v44 }
 0x113   :  { %v456_v41 = vpop.f32.mrf.mxu2 }
 0x114   :  { %v378_v62 = vpop.f32.mrf.mxu0 }
 0x115   :  { %v379_v2 = vadd.f32 %v378_v62, %v310_v60 }
 0x116   :  { %v557_v52 = vpop.f32.mrf.mxu3 }
 0x117   :  { %v416_v10 = vadd.f32 %v415_v34, %v379_v2  ;;  %v558_v3 = vadd.f32 %v557_v52, %v456_v41 }
 0x119   :  { %759 = vst [vmem:[%s1421_s2] sm:$0xff] %v416_v10 }
 0x125   :  { %v650_v6 = vpop.f32.mrf.mxu1 }
 0x12c   :  { %v611_v56 = vpop.f32.mrf.mxu0 }
 0x12d   :  { %v612_v7 = vadd.f32 %v611_v56, %v558_v3  ;;  %v719_v27 = vpop.f32.mrf.mxu2 }
 0x12f   :  { %v651_v26 = vadd.f32 %v650_v6, %v612_v7  ;;  %v756_v30 = vpop.f32.mrf.mxu3 }
 0x131   :  { %v720_v29 = vadd.f32 %v719_v27, %v651_v26 }
 0x133   :  { %v757_v33 = vadd.f32 %v756_v30, %v720_v29 }
 0x135   :  { %761 = vst.msk [vmem:[%s1421_s2 + $0x8] sm:$0xff] %vm760_vm11, %v757_v33 }

</bundles_post_ra>
